<compile_context>
chip_gen: v6e
topology: v6e:2x2x1
jax: 0.10.0
libtpu: 0.0.40
codegen_flags: <defaults>
</compile_context>

<pallas_src>
import functools

import jax
import jax.numpy as jnp
from jax import lax
from jax.experimental import pallas as pl
from jax.experimental.pallas import tpu as pltpu

SN_EPS = 1e-12  # torch.nn.utils.spectral_norm default eps (F.normalize)


def _round_up(x, m):
    return (x + m - 1) // m * m


# ----------------------------------------------------------------------------
# Kernel 1: one power iteration -> inv_sigma (1,1) and updated u (1,out_f).
# Only ONE copy of W is resident in VMEM: the second matvec contracts dim 1 of
# v with dim 1 of W (A @ B^T form) so no W^T input / wrapper transpose needed.
# ----------------------------------------------------------------------------
def _sigma_kernel(w_ref, u_ref, inv_sigma_ref, u_out_ref):
    w = w_ref[...].astype(jnp.float32)   # (out_f, in_f)
    u = u_ref[...].astype(jnp.float32)   # (1, out_f)

    # v = normalize(W^T u), computed as the row vector u @ W.
    wu = jnp.dot(u, w, preferred_element_type=jnp.float32)            # (1, in_f)
    v = wu / jnp.maximum(jnp.sqrt(jnp.sum(wu * wu, axis=1, keepdims=True)), SN_EPS)

    # u_new = normalize(W v), computed as v @ W^T without materializing W^T.
    wv = lax.dot_general(v, w, (((1,), (1,)), ((), ())),
                         preferred_element_type=jnp.float32)          # (1, out_f)
    u_new = wv / jnp.maximum(jnp.sqrt(jnp.sum(wv * wv, axis=1, keepdims=True)), SN_EPS)

    sigma = jnp.sum(u_new * wv, axis=1, keepdims=True)                # (1, 1)
    inv_sigma_ref[...] = 1.0 / sigma
    u_out_ref[...] = u_new


def _power_iteration_inv_sigma(w, u_row):
    out_f, in_f = w.shape
    # A power iteration is just two matvecs. For weights too large to sit as a
    # single resident VMEM block, do it in plain JAX (no Pallas win to protect).
    if w.size * w.dtype.itemsize > 24 * 1024 * 1024:
        w32 = w.astype(jnp.float32)
        wu = u_row @ w32
        v = wu / jnp.maximum(jnp.linalg.norm(wu), SN_EPS)
        wv = v @ w32.T
        u_new = wv / jnp.maximum(jnp.linalg.norm(wv), SN_EPS)
        sigma = jnp.sum(u_new * wv)
        return jnp.reshape(1.0 / sigma, (1, 1)), u_new
    return pl.pallas_call(
        _sigma_kernel,
        out_shape=(jax.ShapeDtypeStruct((1, 1), jnp.float32),
                   jax.ShapeDtypeStruct((1, out_f), jnp.float32)),
        grid=(1,),
        in_specs=[pl.BlockSpec((out_f, in_f), lambda i: (0, 0)),
                  pl.BlockSpec((1, out_f), lambda i: (0, 0))],
        out_specs=(pl.BlockSpec((1, 1), lambda i: (0, 0)),
                   pl.BlockSpec((1, out_f), lambda i: (0, 0))),
    )(w, u_row)


# ----------------------------------------------------------------------------
# Parameter prep (one-time, hoisted out of the per-forward path).
# ----------------------------------------------------------------------------
def prepare_spectral_linear(weight, bias, u, *, compute_dtype=None):
    """Precompute the transposed (and lane-padded only when needed) weight and
    padded bias once; they depend only on the parameters, not on x."""
    out_f, in_f = weight.shape
    if out_f % 128 == 0:
        n_out = out_f                                   # no pad, no output slice
    else:
        # Pad to a lane-dense width (256-aligned for wide layers: full-width
        # vmatmul on v6e/v7x's 256-wide MXU). The matching output slice is the
        # trade-off noted in the review. TODO(synk): benchmark direct masked
        # stores at width out_f against pad+slice for narrow, unaligned out_f.
        n_out = _round_up(out_f, 256 if out_f >= 256 else 128)
    wt = jnp.transpose(weight)                          # (in_f, out_f)
    b2 = jnp.reshape(bias, (1, out_f)).astype(jnp.float32)
    if n_out != out_f:
        wt = jnp.pad(wt, ((0, 0), (0, n_out - out_f)))
        b2 = jnp.pad(b2, ((0, 0), (0, n_out - out_f)))
    if compute_dtype is not None:
        wt = wt.astype(compute_dtype)                   # e.g. bf16 hot path
    return {
        "weight": weight,                               # f32, sigma path only
        "wt_p": wt,                                     # (in_f, n_out) matmul RHS
        "bias_p": b2,                                   # (1, n_out) f32
        "u": jnp.reshape(u, (1, out_f)).astype(jnp.float32),
    }


# ----------------------------------------------------------------------------
# Kernel 2 (hot path): row-tiled fused linear  out = (x @ W^T) * inv_sigma + b
# ----------------------------------------------------------------------------
def _linear_kernel(x_ref, wt_ref, b_ref, inv_sigma_ref, o_ref):
    acc = jnp.dot(x_ref[...], wt_ref[...],
                  preferred_element_type=jnp.float32)   # single MXU matmul
    scale = inv_sigma_ref[0, 0]                         # SMEM scalar -> VPU mul
    o_ref[...] = (acc * scale + b_ref[...]).astype(o_ref.dtype)


def spectral_linear_forward(params, x, *, block_m=512, return_u=False):
    w, wt_p, b_p, u = params["weight"], params["wt_p"], params["bias_p"], params["u"]
    out_f, in_f = w.shape
    n_out = wt_p.shape[1]

    lead = x.shape[:-1]
    x2d = jnp.reshape(x, (-1, in_f))
    M = x2d.shape[0]

    inv_sigma, u_new = _power_iteration_inv_sigma(w, u)

    # Row tiling: multiples of 8 sublanes, no activation padding (Pallas masks
    # the partial tail tile); keep >= 2 grid steps so both v7x TCs get work.
    tm = min(block_m, _round_up(M, 8))
    if M > 8 and pl.cdiv(M, tm) < 2:
        tm = _round_up(pl.cdiv(M, 2), 8)
    grid_m = pl.cdiv(M, tm)

    x_in = x2d if x2d.dtype == wt_p.dtype else x2d.astype(wt_p.dtype)

    out = pl.pallas_call(
        _linear_kernel,
        out_shape=jax.ShapeDtypeStruct((M, n_out), x.dtype),
        grid=(grid_m,),
        in_specs=[
            pl.BlockSpec((tm, in_f), lambda i: (i, 0)),           # x row tile
            pl.BlockSpec((in_f, n_out), lambda i: (0, 0)),        # resident W^T
            pl.BlockSpec((1, n_out), lambda i: (0, 0)),           # resident bias
            pl.BlockSpec(memory_space=pltpu.MemorySpace.SMEM),    # inv_sigma scalar
        ],
        out_specs=pl.BlockSpec((tm, n_out), lambda i: (i, 0)),
        compiler_params=pltpu.CompilerParams(
            dimension_semantics=("parallel",),
            vmem_limit_bytes=32 * 1024 * 1024),
        # TODO(synk): for very large in_f/out_f (resident W^T block > ~20 MiB on
        # v7x's 64 MiB VMEM) add an N grid axis (and K axis + f32 accumulator)
        # instead of keeping the whole weight resident.
    )(x_in, wt_p, b_p, inv_sigma)

    if n_out != out_f:
        out = out[:, :out_f]                 # only when out_f is not lane-aligned
    out = jnp.reshape(out, (*lead, out_f))
    if return_u:
        # PyTorch updates the `u` buffer in place each train-mode forward; this
        # functional API returns the new value for the caller to persist.
        # TODO(synk): PyTorch runs the power iteration under no_grad; forward
        # values match but autograd semantics through sigma would differ.
        return out, jnp.reshape(u_new, (out_f,))
    return out


if __name__ == "__main__":
    B, S, IN_F, OUT_F = 2, 8, 32, 32

    key = jax.random.PRNGKey(0)
    k1, k2, k3, k4 = jax.random.split(key, 4)
    x = jax.random.normal(k1, (B, S, IN_F), jnp.float32)
    w = 0.1 * jax.random.normal(k2, (OUT_F, IN_F), jnp.float32)
    b = 0.1 * jax.random.normal(k3, (OUT_F,), jnp.float32)
    u0 = jax.random.normal(k4, (OUT_F,), jnp.float32)
    u0 = u0 / jnp.maximum(jnp.linalg.norm(u0), SN_EPS)

    params = prepare_spectral_linear(w, b, u0)           # f32 hot path
    fwd = jax.jit(functools.partial(spectral_linear_forward, return_u=True))
    out, u_new = fwd(params, x)
    jax.block_until_ready(out)

    # Pure-JAX reference of the same train-mode forward (1 power iteration).
    v_ref = u0 @ w
    v_ref = v_ref / jnp.maximum(jnp.linalg.norm(v_ref), SN_EPS)
    u_ref = w @ v_ref
    u_ref = u_ref / jnp.maximum(jnp.linalg.norm(u_ref), SN_EPS)
    sigma_ref = u_ref @ w @ v_ref
    ref = x @ (w / sigma_ref).T + b

    assert out.shape == (B, S, OUT_F), out.shape
    assert jnp.all(jnp.isfinite(out))
    assert jnp.allclose(out, ref, rtol=1e-4, atol=1e-4), \
        float(jnp.max(jnp.abs(out - ref)))
    assert jnp.allclose(u_new, u_ref, rtol=1e-3, atol=1e-3)

    # Optional bf16 hot path (f32 accumulation + f32 epilogue): ~2x MXU rate and
    # half the weight/activation HBM traffic on v6e/v7x.
    params_bf16 = prepare_spectral_linear(w, b, u0, compute_dtype=jnp.bfloat16)
    out_bf16 = jax.jit(spectral_linear_forward)(params_bf16, x)
    jax.block_until_ready(out_bf16)
    assert out_bf16.shape == (B, S, OUT_F)
    assert jnp.all(jnp.isfinite(out_bf16))
    assert jnp.allclose(out_bf16, ref, rtol=5e-2, atol=1e-1)

    print("KERNEL_OK")
</pallas_src>

<mosaic_0001>
module attributes {stable_mosaic.version = 11 : i64} {
  func.func @_sigma_kernel(%arg0: i32, %arg1: memref<32x32xf32, #tpu.memory_space<vmem>>, %arg2: memref<1x32xf32, #tpu.memory_space<vmem>>, %arg3: memref<1x1xf32, #tpu.memory_space<vmem>>, %arg4: memref<1x32xf32, #tpu.memory_space<vmem>>) attributes {dimension_semantics = [#tpu.dimension_semantics<arbitrary>], iteration_bounds = array<i64: 1>, scalar_prefetch = 0 : i64, scratch_operands = 0 : i64, tpu.core_type = #tpu.core_type<tc>, window_params = [{pipeline_mode = #tpu.pipeline_mode<synchronous>, transform_indices = @transform_0, window_bounds = array<i64: 32, 32>}, {pipeline_mode = #tpu.pipeline_mode<synchronous>, transform_indices = @transform_1, window_bounds = array<i64: 1, 32>}, {pipeline_mode = #tpu.pipeline_mode<synchronous>, transform_indices = @transform_2, window_bounds = array<i64: 1, 1>}, {pipeline_mode = #tpu.pipeline_mode<synchronous>, transform_indices = @transform_3, window_bounds = array<i64: 1, 32>}]} {
    %c0 = arith.constant 0 : index
    %c0_0 = arith.constant 0 : index
    %0 = vector.load %arg1[%c0, %c0_0] : memref<32x32xf32, #tpu.memory_space<vmem>>, vector<32x32xf32>
    %c0_1 = arith.constant 0 : index
    %c0_2 = arith.constant 0 : index
    %1 = vector.load %arg2[%c0_1, %c0_2] : memref<1x32xf32, #tpu.memory_space<vmem>>, vector<1x32xf32>
    %cst = arith.constant dense<0.000000e+00> : vector<1x32xf32>
    %2 = tpu.matmul %1, %0, %cst {dimension_numbers = #tpu.dot_dimension_numbers<[1], [0], [0], [1], [0, 0, 1, 1], [], []>} : vector<1x32xf32>, vector<32x32xf32>, vector<1x32xf32> -> vector<1x32xf32>
    %3 = arith.mulf %2, %2 : vector<1x32xf32>
    %cst_3 = arith.constant dense<0.000000e+00> : vector<1xf32>
    %4 = vector.multi_reduction <add>, %3, %cst_3 [1] : vector<1x32xf32> to vector<1xf32>
    %5 = vector.shape_cast %4 : vector<1xf32> to vector<1x1xf32>
    %6 = math.sqrt %5 : vector<1x1xf32>
    %cst_4 = arith.constant 9.99999996E-13 : f32
    %7 = vector.broadcast %cst_4 : f32 to vector<1x1xf32>
    %8 = arith.maximumf %6, %7 : vector<1x1xf32>
    %9 = vector.broadcast %8 : vector<1x1xf32> to vector<1x32xf32>
    %10 = arith.divf %2, %9 : vector<1x32xf32>
    %cst_5 = arith.constant dense<0.000000e+00> : vector<1x32xf32>
    %11 = tpu.matmul %10, %0, %cst_5 {dimension_numbers = #tpu.dot_dimension_numbers<[1], [1], [0], [0], [0, 0, 1, 0], [], []>} : vector<1x32xf32>, vector<32x32xf32>, vector<1x32xf32> -> vector<1x32xf32>
    %12 = arith.mulf %11, %11 : vector<1x32xf32>
    %cst_6 = arith.constant dense<0.000000e+00> : vector<1xf32>
    %13 = vector.multi_reduction <add>, %12, %cst_6 [1] : vector<1x32xf32> to vector<1xf32>
    %14 = vector.shape_cast %13 : vector<1xf32> to vector<1x1xf32>
    %15 = math.sqrt %14 : vector<1x1xf32>
    %cst_7 = arith.constant 9.99999996E-13 : f32
    %16 = vector.broadcast %cst_7 : f32 to vector<1x1xf32>
    %17 = arith.maximumf %15, %16 : vector<1x1xf32>
    %18 = vector.broadcast %17 : vector<1x1xf32> to vector<1x32xf32>
    %19 = arith.divf %11, %18 : vector<1x32xf32>
    %20 = arith.mulf %19, %11 : vector<1x32xf32>
    %cst_8 = arith.constant dense<0.000000e+00> : vector<1xf32>
    %21 = vector.multi_reduction <add>, %20, %cst_8 [1] : vector<1x32xf32> to vector<1xf32>
    %22 = vector.shape_cast %21 : vector<1xf32> to vector<1x1xf32>
    %cst_9 = arith.constant 1.000000e+00 : f32
    %23 = vector.broadcast %cst_9 : f32 to vector<1x1xf32>
    %24 = arith.divf %23, %22 : vector<1x1xf32>
    %c0_10 = arith.constant 0 : index
    %c0_11 = arith.constant 0 : index
    %25 = vector.load %arg3[%c0_10, %c0_11] : memref<1x1xf32, #tpu.memory_space<vmem>>, vector<1x1xf32>
    tpu.vector_store %arg3[%c0_10, %c0_11], %24 {strides = array<i32>} : memref<1x1xf32, #tpu.memory_space<vmem>>, vector<1x1xf32>,
    %c0_12 = arith.constant 0 : index
    %c0_13 = arith.constant 0 : index
    %26 = vector.load %arg4[%c0_12, %c0_13] : memref<1x32xf32, #tpu.memory_space<vmem>>, vector<1x32xf32>
    tpu.vector_store %arg4[%c0_12, %c0_13], %19 {strides = array<i32>} : memref<1x32xf32, #tpu.memory_space<vmem>>, vector<1x32xf32>,
    return
  }
  func.func @transform_0(%arg0: i32) -> (i32, i32) {
    %c0_i32 = arith.constant 0 : i32
    %c0_i32_0 = arith.constant 0 : i32
    %c0_i32_1 = arith.constant 0 : i32
    return %c0_i32, %c0_i32_0 : i32, i32
  }
  func.func @transform_1(%arg0: i32) -> (i32, i32) {
    %c0_i32 = arith.constant 0 : i32
    %c0_i32_0 = arith.constant 0 : i32
    %c0_i32_1 = arith.constant 0 : i32
    return %c0_i32, %c0_i32_0 : i32, i32
  }
  func.func @transform_2(%arg0: i32) -> (i32, i32) {
    %c0_i32 = arith.constant 0 : i32
    %c0_i32_0 = arith.constant 0 : i32
    %c0_i32_1 = arith.constant 0 : i32
    return %c0_i32, %c0_i32_0 : i32, i32
  }
  func.func @transform_3(%arg0: i32) -> (i32, i32) {
    %c0_i32 = arith.constant 0 : i32
    %c0_i32_0 = arith.constant 0 : i32
    %c0_i32_1 = arith.constant 0 : i32
    return %c0_i32, %c0_i32_0 : i32, i32
  }
}

module attributes {stable_mosaic.version = 11 : i64} {
  func.func @_linear_kernel(%arg0: i32, %arg1: memref<8x32xf32, #tpu.memory_space<vmem>>, %arg2: memref<32x128xf32, #tpu.memory_space<vmem>>, %arg3: memref<1x128xf32, #tpu.memory_space<vmem>>, %arg4: memref<1x1xf32, #tpu.memory_space<smem>>, %arg5: memref<8x128xf32, #tpu.memory_space<vmem>>) attributes {dimension_semantics = [#tpu.dimension_semantics<parallel>], iteration_bounds = array<i64: 2>, scalar_prefetch = 0 : i64, scratch_operands = 0 : i64, tpu.core_type = #tpu.core_type<tc>, window_params = [{transform_indices = @transform_0, window_bounds = array<i64: 8, 32>}, {pipeline_mode = #tpu.pipeline_mode<synchronous>, transform_indices = @transform_1, window_bounds = array<i64: 32, 128>}, {pipeline_mode = #tpu.pipeline_mode<synchronous>, transform_indices = @transform_2, window_bounds = array<i64: 1, 128>}, {transform_indices = @transform_3, window_bounds = array<i64: 1, 1>}, {transform_indices = @transform_4, window_bounds = array<i64: 8, 128>}]} {
    %c0 = arith.constant 0 : index
    %c0_0 = arith.constant 0 : index
    %0 = vector.load %arg1[%c0, %c0_0] : memref<8x32xf32, #tpu.memory_space<vmem>>, vector<8x32xf32>
    %c0_1 = arith.constant 0 : index
    %c0_2 = arith.constant 0 : index
    %1 = vector.load %arg2[%c0_1, %c0_2] : memref<32x128xf32, #tpu.memory_space<vmem>>, vector<32x128xf32>
    %cst = arith.constant dense<0.000000e+00> : vector<8x128xf32>
    %2 = tpu.matmul %0, %1, %cst {dimension_numbers = #tpu.dot_dimension_numbers<[1], [0], [0], [1], [0, 0, 1, 1], [], []>} : vector<8x32xf32>, vector<32x128xf32>, vector<8x128xf32> -> vector<8x128xf32>
    %c0_3 = arith.constant 0 : index
    %c0_4 = arith.constant 0 : index
    %3 = memref.load %arg4[%c0_3, %c0_4] : memref<1x1xf32, #tpu.memory_space<smem>>
    %4 = vector.broadcast %3 : f32 to vector<8x128xf32>
    %5 = arith.mulf %2, %4 : vector<8x128xf32>
    %c0_5 = arith.constant 0 : index
    %c0_6 = arith.constant 0 : index
    %6 = vector.load %arg3[%c0_5, %c0_6] : memref<1x128xf32, #tpu.memory_space<vmem>>, vector<1x128xf32>
    %7 = vector.broadcast %6 : vector<1x128xf32> to vector<8x128xf32>
    %8 = arith.addf %5, %7 : vector<8x128xf32>
    %c0_7 = arith.constant 0 : index
    %c0_8 = arith.constant 0 : index
    %9 = vector.load %arg5[%c0_7, %c0_8] : memref<8x128xf32, #tpu.memory_space<vmem>>, vector<8x128xf32>
    tpu.vector_store %arg5[%c0_7, %c0_8], %8 {strides = array<i32>} : memref<8x128xf32, #tpu.memory_space<vmem>>, vector<8x128xf32>,
    return
  }
  func.func @transform_0(%arg0: i32) -> (i32, i32) {
    %c0_i32 = arith.constant 0 : i32
    %c0_i32_0 = arith.constant 0 : i32
    return %arg0, %c0_i32 : i32, i32
  }
  func.func @transform_1(%arg0: i32) -> (i32, i32) {
    %c0_i32 = arith.constant 0 : i32
    %c0_i32_0 = arith.constant 0 : i32
    %c0_i32_1 = arith.constant 0 : i32
    return %c0_i32, %c0_i32_0 : i32, i32
  }
  func.func @transform_2(%arg0: i32) -> (i32, i32) {
    %c0_i32 = arith.constant 0 : i32
    %c0_i32_0 = arith.constant 0 : i32
    %c0_i32_1 = arith.constant 0 : i32
    return %c0_i32, %c0_i32_0 : i32, i32
  }
  func.func @transform_3(%arg0: i32) -> (i32, i32) {
    %c0_i32 = arith.constant 0 : i32
    %c0_i32_0 = arith.constant 0 : i32
    %c0_i32_1 = arith.constant 0 : i32
    return %c0_i32, %c0_i32_0 : i32, i32
  }
  func.func @transform_4(%arg0: i32) -> (i32, i32) {
    %c0_i32 = arith.constant 0 : i32
    %c0_i32_0 = arith.constant 0 : i32
    return %arg0, %c0_i32 : i32, i32
  }
}

</mosaic_0001>

<bundles_post_ra>
// kernel: spectral_linear_forward.3
= control target key start
LH: loop header
LB: loop body
LE: loop exit
PB: predicated region body
PF: predicated region fallthrough
CT: control target
= control target key end

     0   :  { %s649_s0 = inlined_call_operand.hbm [shape: f32[16,32], index: 0, kind: input, shape index: {}]   ;;  %s650_s1 = inlined_call_operand.vmem [shape: f32[32,128], index: 1, kind: input, shape index: {}]   ;;  %s651_s2 = inlined_call_operand.vmem [shape: f32[1,128], index: 2, kind: input, shape index: {}]   ;;  %s652_s3 = inlined_call_operand.<no memory space> [shape: f32[1,1], index: 3, kind: input, shape index: {}]   ;;  %s653_s4 = inlined_call_operand.vmem [shape: f32[16,128], index: 4, kind: output, shape index: {}]  }
   0x1   :  { %9 = sst [smem:[#allocation2]] %s652_s3 }
   0x2   :  { %10 = vsyncpa [#allocation4], 0 }
   0x3   :  { %12 = vsyncpa [#allocation4 + $0x1], 0  ;;  %s534_s17 = smov 0   ;;  %s536_s18 = smov 0  }
   0x4   :  { %s538_s19 = smov 0   ;;  %s540_s20 = smov 0  }
   0x5 LB: > { %s553_s3 = sadd.s32 4294967295, %s501_s20   ;;  %s556_s21 = sadd.s32 1, %s501_s20   ;;  %s501_s20 = sphi %s540_s20, %s663_s20   ;;  %s497_s19 = sphi %s538_s19, %s662_s19   ;;  %s493_s18 = sphi %s536_s18, %s661_s18   ;;  %s489_s17 = sphi %s534_s17, %s660_s17  }
   0x6   : > { %s22_s22 = ssub.s32 %s501_s20, %s556_s21  ;;  %s25_s23 = sadd.s32 1, %s497_s19 }
   0x7   : > { %p23_p0 = scmp.eq.s32.totalorder %s22_s22, 0  ;;  %p32_p1 = scmp.ne.s32.totalorder %s497_s19, %s493_s18 }
   0x8   : > { %p33_p2 = scmp.eq.s32.totalorder %s501_s20, 0  ;;  %p38_p3 = scmp.ne.s32.totalorder %s493_s18, %s489_s17 }
   0x9   : > { %s566_s24 = scalar_select %p23_p0, %s497_s19, %s25_s23  }
   0xa   : > { %p34_p4 = por %p33_p2, %p32_p1  ;;  %p39_p5 = scmp.eq.s32.totalorder %s553_s3, 0 }
   0xb   : > { %p404_p6 = scmp.lt.s32.totalorder %s501_s20, 2  ;;  %s160_s26 = sand.u32 1, %s497_s19  }
   0xc   : > { %p570_p7 = por %p39_p5, %p38_p3  ;;  %s373_s27 = sshll.u32 %s160_s26, 3 }
   0xd   : > { %s374_s28 = sshll.u32 %s501_s20, 7  ;;  %s164_s6 = scalar_lea.vmem [#allocation3], %s373_s27 }
   0xe   : > { %s655_s25 = scalar_select %p570_p7, 1, 0 }
   0xf   : > { %s579_s5 = scalar_lea.hbm %s649_s0, %s374_s28  ;;  %s171_s7 = sshll.u32 %s164_s6, 4  ;;  %s581_s7 = int_to_ptr.vmem [resolvable:$true] %s171_s7 }
  0x10   : > { %p583_p8 = pnand %p404_p6, %p34_p4  ;;  %s161_s9 = scalar_lea.sflag [#allocation4], %s160_s26 }
  0x11   : > { %s439_s10 = scalar_lea.hbm %s579_s5, 128  ;;  %s444_s13 = scalar_lea.hbm %s649_s0, 256 }
  0x12   : > { %p440_p11 = scmp.ne.s32.totalorder %s579_s5, %s439_s10  ;;  %p441_p12 = pneg %p583_p8 }
  0x13   : > { %p445_p1 = scmp.lt.s32.totalorder %s579_s5, %s649_s0  ;;  %p446_p2 = scmp.lt.s32.totalorder %s444_s13, %s439_s10 }
  0x14   : > { %p442_p13 = pnand %p441_p12, %p440_p11 }
  0x15   : > { %p447_p3 = por %p446_p2, %p445_p1 }
  0x16   : > { %p443_p0 = pneg %p442_p13 }
  0x18   : > { %p448_p4 = pnand %p447_p3, %p443_p0 }
  0x1a   : > { %451 = shalt.err (!%p448_p4)
}
  0x1b   : > { %s452_s16 = scalar_lea.vmem %s581_s7, 128  ;;  %s503_s17 = smov [#allocation3]  }
  0x1c   : > { %p453_p5 = scmp.ne.s32.totalorder %s581_s7, %s452_s16  ;;  %s457_s22 = sshll.u32 %s503_s17, 4  ;;  %s458_s22 = int_to_ptr.vmem [resolvable:$false] %s457_s22 }
  0x1d   : > { %s459_s23 = scalar_lea.vmem %s458_s22, 256  ;;  %p460_p13 = scmp.lt.s32.totalorder %s581_s7, %s458_s22 }
  0x1e   : > { %p455_p6 = pnand %p453_p5, %p441_p12  ;;  %p461_p9 = scmp.lt.s32.totalorder %s459_s23, %s452_s16 }
  0x20   : > { %p456_p11 = pneg %p455_p6  ;;  %p462_p10 = por %p461_p9, %p460_p13 }
  0x22   : > { %p463_p7 = pnand %p462_p10, %p456_p11 }
  0x24   : > { %466 = shalt.err (!%p463_p7)
}
  0x25   : > { %403 = dma.hbm_to_vmem [thread:$0]  (!%p583_p8), %s579_s5, 128, %s581_s7, %s161_s9  }
  0x26   : > { %p657_p0 = scmp.lt.s32.totalorder %s501_s20, 3  ;;  %p658_p1 = scmp.ge.s32.totalorder %s501_s20, 1 }
  0x28   : > { %p177_p12 = pnand %p658_p1, %p657_p0 }
  0x29   : > { %s182_s26 = sand.u32 (!%p177_p12), 1, %s493_s18   ;;  %p659_p9 = scmp.ne.s32.totalorder (!%p177_p12), %s655_s25, 0 }
  0x2a   : > { %180 = sbr.rel (%p177_p12) target bundleno = 255 (0xff), region = 36  ;;  %s376_s27 = sshll.u32 (!%p177_p12), %s182_s26, 3 }
  0x2b   : > { %s183_s28 = scalar_lea.sflag (!%p177_p12), [#allocation4], %s182_s26  ;;  %s186_s29 = scalar_lea.vmem (!%p177_p12), [#allocation3], %s376_s27 }
  0x2f   : > { %484 = dma.done.wait (%p659_p9), %s183_s28, 128  }
  0x30   : > { %486 = vsyncadd (%p659_p9), %s183_s28, 4294967168  ;;  %v504_v0 = vmov 0.0   ;;  %vm505_vm0 = vmmov 0   ;;  %v218_v1 = vld [vmem:[%s650_s1 + $0x18] sm:$0xff]  ;;  %v217_v2 = vld [vmem:[%s650_s1 + $0x10] sm:$0xff]  ;;  %vm219_vm1 = vcmask 261120  }
  0x31   : > { %387 = vmatprep.subr.mxu0 %v504_v0  ;;  %395 = vmatprep.mubr.msk.f32.mxu0 %vm505_vm0, %v504_v0  ;;  %v216_v3 = vld [vmem:[%s650_s1 + $0x8] sm:$0xff]  ;;  %v215_v4 = vld [vmem:[%s650_s1] sm:$0xff]  ;;  %s293_s10 = sld [smem:[#allocation2]]  ;;  %p210_p7 = scmp.lt.s32.totalorder %s553_s3, 1 }
  0x32   : > { %388 = vmatpush3.msra.mxu0 %v218_v1  ;;  %v214_v5 = vld [vmem:[%s186_s29] sm:$0xff] }
  0x33   : > { %389 = vmatprep.subr.mxu0 %v504_v0  ;;  %s665_s3 = smov (!%p210_p7, %s553_s3), 1  ;;  %v379_v8 = vld [vmem:[%s651_s2] ss:$0 sm:$0xff] }
  0x34   : > { %390 = vmatpush3.msra.mxu0 %v217_v2  ;;  %s377_s11 = sshll.u32 %s665_s3, 3 }
  0x35   : > { %391 = vmatprep.subr.mxu0 %v504_v0  ;;  %s213_s16 = scalar_lea.vmem %s653_s4, %s377_s11 }
  0x36   : > { %392 = vmatpush3.msra.mxu0 %v216_v3 }
  0x37   : > { %393 = vmatprep.subr.mxu0 %v504_v0  ;;  %v294_v6 = vstv %s293_s10 }
  0x38   : > { %394 = vmatpush3.msra.mxu0 %v215_v4 }
  0x39   : > { %396 = vmatmul.mubr.msk.f32.vlgmr.msra.gmra.mxu0 %vm219_vm1, %v214_v5 }
  0xf9   : > { %v289_v7 = vpop.f32.mrf.mxu0 }
  0xfa   : > { %v295_v9 = vmul.f32 %v294_v6, %v289_v7 }
  0xfb   : > { %v397_v10 = vpop.f32.mrf.mxu0 }
  0xfc   : > { %v303_v11 = vadd.f32 %v379_v8, %v295_v9 }
  0xfe   : > { %304 = vst [vmem:[%s213_s16] sm:$0xff] %v303_v11 }
  0xff PF: > { %p15_p8 = scmp.ge.s32.totalorder %s556_s21, 4   ;;  %s660_s17 = smov %s493_s18 }
 0x100   : > { %s661_s18 = smov %s497_s19  ;;  %s662_s19 = smov %s566_s24 }
 0x101   : > { %s663_s20 = smov %s556_s21  ;;  %17 = sbr.rel (!%p15_p8) target bundleno = 5 (0x5), region = 76 }
 0x106   :  { %324 = vsyncpa [#allocation4], 1 }
 0x107   :  { %326 = vsyncpa [#allocation4 + $0x1], 1 }

// kernel: spectral_linear_forward.2
= control target key start
LH: loop header
LB: loop body
LE: loop exit
PB: predicated region body
PF: predicated region fallthrough
CT: control target
= control target key end

     0   :  { %9 = vsyncpa [#allocation3], 0  ;;  %s467_s0 = inlined_call_operand.hbm [shape: f32[32,32], index: 0, kind: input, shape index: {}]   ;;  %s468_s1 = inlined_call_operand.hbm [shape: f32[1,32], index: 1, kind: input, shape index: {}]   ;;  %s469_s2 = inlined_call_operand.hbm [shape: f32[1,1], index: 2, kind: output, shape index: {0}]   ;;  %s470_s3 = inlined_call_operand.hbm [shape: f32[1,32], index: 3, kind: output, shape index: {1}]  }
   0x1   :  { %10 = vsyncpa [#allocation6], 0 }
   0x2   :  { %11 = vsyncpa [#allocation4], 0 }
   0x3   :  { %12 = vsyncpa [#allocation9], 0  ;;  %s417_s12 = smov [#allocation2]  }
   0x4   :  { %s18_s13 = sshll.u32 %s417_s12, 4  ;;  %s19_s13 = int_to_ptr.vmem [resolvable:$true] %s18_s13 }
   0x5   :  { %s337_s14 = scalar_lea.vmem %s19_s13, 512  ;;  %p342_p1 = scmp.lt.s32.totalorder %s19_s13, %s19_s13 }
   0x6   :  { %p338_p0 = scmp.ne.s32.totalorder %s19_s13, %s337_s14  ;;  %p343_p2 = scmp.lt.s32.totalorder %s337_s14, %s337_s14 }
   0x8   :  { %p344_p3 = por %p343_p2, %p342_p1 }
   0xa   :  { %p345_p4 = pnand %p344_p3, %p338_p0 }
   0xc   :  { %348 = shalt.err (!%p345_p4)
}
   0xd   :  { %s418_s15 = smov 128   ;;  %s419_s16 = smov 8  }
   0xe   :  { %24 = dma.hbm_to_vmem [thread:$0]  %s467_s0, 512, %s19_s13, [#allocation3], %s418_s15, %s418_s15, %s419_s16  }
   0xf   :  { %s420_s19 = smov [#allocation5]  }
  0x10   :  { %s31_s20 = sshll.u32 %s420_s19, 4  ;;  %s32_s20 = int_to_ptr.vmem [resolvable:$true] %s31_s20 }
  0x11   :  { %s357_s21 = scalar_lea.vmem %s32_s20, 16  ;;  %s361_s22 = scalar_lea.vmem %s32_s20, 32 }
  0x12   :  { %p358_p5 = scmp.ne.s32.totalorder %s32_s20, %s357_s21  ;;  %p362_p6 = scmp.lt.s32.totalorder %s32_s20, %s32_s20 }
  0x13   :  { %p363_p7 = scmp.lt.s32.totalorder %s361_s22, %s357_s21 }
  0x15   :  { %p364_p8 = por %p363_p7, %p362_p6 }
  0x17   :  { %p365_p9 = pnand %p364_p8, %p358_p5 }
  0x19   :  { %368 = shalt.err (!%p365_p9)
}
  0x1a   :  { %34 = dma.hbm_to_vmem [thread:$0]  %s468_s1, 16, %s32_s20, [#allocation6]  }
  0x1b   :  { %409 = dma.done.wait [#allocation3], 512  }
  0x1c   :  { %410 = vsyncadd [#allocation3], 4294966784 }
  0x1d   :  { %411 = dma.done.wait [#allocation6], 16  }
  0x1e   :  { %412 = vsyncadd [#allocation6], 4294967280  ;;  %v421_v0 = vmov 0.0   ;;  %vm422_vm0 = vmmov 0   ;;  %v44_v1 = vld [vmem:[#allocation2 + $0x18] sm:$0xff]  ;;  %v43_v2 = vld [vmem:[#allocation2 + $0x10] sm:$0xff] }
  0x1f   :  { %289 = vmatprep.subr.mxu0 %v421_v0  ;;  %297 = vmatprep.mubr.msk.f32.mxu0 %vm422_vm0, %v421_v0  ;;  %vm46_vm1 = vcmask 261120   ;;  %v42_v3 = vld [vmem:[#allocation2 + $0x8] sm:$0xff]  ;;  %v41_v4 = vld [vmem:[#allocation2] sm:$0xff]  ;;  %vm121_vm2 = vcmask 253952   ;;  %s423_s0 = smov [#allocation8]  }
  0x20   :  { %300 = vmatprep.subr.mxu1 %v421_v0  ;;  %308 = vmatprep.mubr.msk.f32.mxu1 %vm422_vm0, %v421_v0  ;;  %v45_v5 = vld [vmem:[#allocation5] sm:$0x1]  ;;  %s259_s1 = sshll.u32 %s423_s0, 4  ;;  %s260_s1 = int_to_ptr.vmem [resolvable:$true] %s259_s1 }
  0x21   :  { %290 = vmatpush3.msra.mxu0 %v44_v1  ;;  %301 = vmatpush3.xpose.msk.msra.mxu1 %vm46_vm1, %v44_v1  ;;  %s369_s25 = scalar_lea.vmem %s260_s1, 16  ;;  %s373_s26 = scalar_lea.vmem %s260_s1, 32 }
  0x22   :  { %291 = vmatprep.subr.mxu0 %v421_v0  ;;  %302 = vmatprep.subr.mxu1 %v421_v0  ;;  %p370_p10 = scmp.ne.s32.totalorder %s260_s1, %s369_s25  ;;  %p374_p11 = scmp.lt.s32.totalorder %s260_s1, %s260_s1 }
  0x23   :  { %292 = vmatpush3.msra.mxu0 %v43_v2  ;;  %p375_p12 = scmp.lt.s32.totalorder %s373_s26, %s369_s25 }
  0x24   :  { %293 = vmatprep.subr.mxu0 %v421_v0 }
  0x25   :  { %294 = vmatpush3.msra.mxu0 %v42_v3  ;;  %303 = vmatpush3.xpose.msk.msra.mxu1 %vm46_vm1, %v43_v2  ;;  %p376_p13 = por %p375_p12, %p374_p11 }
  0x26   :  { %295 = vmatprep.subr.mxu0 %v421_v0  ;;  %304 = vmatprep.subr.mxu1 %v421_v0 }
  0x27   :  { %296 = vmatpush3.msra.mxu0 %v41_v4  ;;  %p377_p0 = pnand %p376_p13, %p370_p10 }
  0x28   :  { %298 = vmatmul.mubr.msk.f32.vlgmr.msra.gmra.mxu0 %vm46_vm1, %v45_v5 }
  0x29   :  { %305 = vmatpush3.xpose.msk.msra.mxu1 %vm46_vm1, %v42_v3 }
  0x2a   :  { %306 = vmatprep.subr.mxu1 %v421_v0 }
  0x2d   :  { %307 = vmatpush3.xpose.msk.msra.mxu1 %vm46_vm1, %v41_v4 }
  0xe8   :  { %v116_v6 = vpop.f32.mrf.mxu0 }
  0xe9   :  { %v120_v7 = vmul.f32 %v116_v6, %v116_v6 }
  0xea   :  { %v299_v8 = vpop.f32.mrf.mxu0 }
  0xeb   :  { %v122_v9 = vsel %vm121_vm2, %v120_v7, 0.0 }
  0xec   :  { %123 = vadd.xlane.f32.xlu0 %v122_v9 }
 0x175   :  { %v124_v10 = vpop.xlane.xlu0 %123 }
 0x176   :  { %319 = vrsqrt.f32 %v124_v10  ;;  %vm127_vm3 = vcmp.eq.f32.partialorder %v124_v10, inf  ;;  %v130_v13 = vand.u32 2147483648, %v124_v10  ;;  %vm129_vm4 = vcmp.eq.f32.partialorder %v124_v10, 0.0 }
 0x183   :  { %v320_v11 = vpop.eup %319 }
 0x184   :  { %v126_v12 = vmul.f32 %v320_v11, %v124_v10 }
 0x186   :  { %v128_v14 = vsel %vm127_vm3, %v124_v10, %v126_v12 }
 0x187   :  { %v131_v15 = vsel %vm129_vm4, %v130_v13, %v128_v14 }
 0x188   :  { %v132_v16 = vmax.f32 %v131_v15, 1e-12 }
 0x18a   :  { %321 = vrcp.f32 %v132_v16 }
 0x197   :  { %v322_v17 = vpop.eup %321 }
 0x198   :  { %v134_v18 = vmul.f32 %v322_v17, %v116_v6 }
 0x19a   :  { %309 = vmatmul.mubr.msk.f32.vlgmr.msra.gmra.mxu1 %vm46_vm1, %v134_v18 }
 0x25a   :  { %v216_v19 = vpop.f32.mrf.mxu1 }
 0x25b   :  { %v220_v20 = vmul.f32 %v216_v19, %v216_v19 }
 0x25c   :  { %v310_v21 = vpop.f32.mrf.mxu1 }
 0x25d   :  { %v221_v22 = vsel %vm121_vm2, %v220_v20, 0.0 }
 0x25e   :  { %222 = vadd.xlane.f32.xlu0 %v221_v22 }
 0x2e7   :  { %v223_v23 = vpop.xlane.xlu0 %222 }
 0x2e8   :  { %323 = vrsqrt.f32 %v223_v23  ;;  %vm226_vm5 = vcmp.eq.f32.partialorder %v223_v23, inf  ;;  %v229_v26 = vand.u32 2147483648, %v223_v23  ;;  %vm228_vm6 = vcmp.eq.f32.partialorder %v223_v23, 0.0 }
 0x2f5   :  { %v324_v24 = vpop.eup %323 }
 0x2f6   :  { %v225_v25 = vmul.f32 %v324_v24, %v223_v23 }
 0x2f8   :  { %v227_v27 = vsel %vm226_vm5, %v223_v23, %v225_v25 }
 0x2f9   :  { %v230_v28 = vsel %vm228_vm6, %v229_v26, %v227_v27 }
 0x2fa   :  { %v231_v29 = vmax.f32 %v230_v28, 1e-12 }
 0x2fc   :  { %325 = vrcp.f32 %v231_v29 }
 0x309   :  { %v326_v30 = vpop.eup %325 }
 0x30a   :  { %v233_v31 = vmul.f32 %v326_v30, %v216_v19 }
 0x30c   :  { %v234_v32 = vmul.f32 %v233_v31, %v216_v19  ;;  %242 = vst.msk [vmem:[#allocation8] sm:$0x1] %vm121_vm2, %v233_v31 }
 0x30e   :  { %v235_v33 = vsel %vm121_vm2, %v234_v32, 0.0 }
 0x30f   :  { %236 = vadd.xlane.f32.xlu1 %v235_v33 }
 0x310   :  { %380 = shalt.err (!%p377_p0)
}
 0x311   :  { %262 = dma.vmem_to_hbm [thread:$0]  %s260_s1, 16, %s470_s3, [#allocation9]   ;;  %vm240_vm7 = vcmask 0  }
 0x312   :  { %s424_s29 = smov [#allocation7]  }
 0x313   :  { %s249_s30 = sshll.u32 %s424_s29, 4  ;;  %s250_s30 = int_to_ptr.vmem [resolvable:$true] %s249_s30 }
 0x314   :  { %s389_s4 = scalar_lea.vmem %s250_s30, 16  ;;  %s393_s5 = scalar_lea.vmem %s250_s30, 32 }
 0x315   :  { %p390_p1 = scmp.ne.s32.totalorder %s250_s30, %s389_s4  ;;  %p394_p2 = scmp.lt.s32.totalorder %s250_s30, %s250_s30 }
 0x316   :  { %p395_p3 = scmp.lt.s32.totalorder %s393_s5, %s389_s4 }
 0x318   :  { %p396_p4 = por %p395_p3, %p394_p2 }
 0x31a   :  { %p397_p5 = pnand %p396_p4, %p390_p1 }
 0x398   :  { %v237_v34 = vpop.xlane.xlu1 %236 }
 0x399   :  { %327 = vrcp.f32 %v237_v34 }
 0x3a6   :  { %v328_v35 = vpop.eup %327 }
 0x3a7   :  { %241 = vst.msk [vmem:[#allocation7] sm:$0x1] %vm240_vm7, %v328_v35 }
 0x3a8   :  { %400 = shalt.err (!%p397_p5)
}
 0x3a9   :  { %252 = dma.vmem_to_hbm [thread:$0]  %s250_s30, 16, %s469_s2, [#allocation4]  }
 0x3aa   :  { %413 = dma.done.wait [#allocation4], 16  }
 0x3ab   :  { %414 = vsyncadd [#allocation4], 4294967280 }
 0x3ac   :  { %415 = dma.done.wait [#allocation9], 16  }
 0x3ad   :  { %416 = vsyncadd [#allocation9], 4294967280 }
 0x3ae   :  { %269 = vsyncpa [#allocation3], 1 }
 0x3af   :  { %270 = vsyncpa [#allocation6], 1 }
 0x3b0   :  { %271 = vsyncpa [#allocation4], 1 }
 0x3b1   :  { %272 = vsyncpa [#allocation9], 1 }

</bundles_post_ra>
